<compile_context>
chip_gen: v6e
topology: v6e:2x2x1
jax: 0.10.0
libtpu: 0.0.40
codegen_flags: <defaults>
</compile_context>

<pallas_src>
import functools

import numpy as np
import jax
import jax.numpy as jnp
from jax.experimental import pallas as pl
from jax.experimental.pallas import tpu as pltpu

_LANE = 128
_SUBLANE = 8


def _round_up(x: int, m: int) -> int:
    return -(-x // m) * m


def _round_down(x: int, m: int) -> int:
    return (x // m) * m


# --------------------------------------------------------------------------
# Generation-aware VMEM budgets.
# --------------------------------------------------------------------------
@functools.lru_cache(maxsize=None)
def _tpu_budgets():
    """Returns (work_budget_bytes, vmem_limit_bytes, dual_tc)."""
    vmem_bytes = None
    try:
        vmem_bytes = int(pltpu.get_tpu_info().vmem_capacity_bytes)
    except Exception:
        vmem_bytes = None
    if vmem_bytes is None or vmem_bytes <= 0:
        vmem_bytes = 64 << 20            # conservative: v7x per-TC VMEM
    # v7x: 64 MiB / TC and 2 TensorCores (needs >=2 parallel grid steps);
    # v5e / v6e: 128 MiB and a single TensorCore.
    dual_tc = vmem_bytes <= (64 << 20)
    work_budget = min(vmem_bytes // 2, 48 << 20)        # per-step working set
    vmem_limit = min((vmem_bytes * 3) // 4, 64 << 20)   # scoped VMEM limit
    return work_budget, vmem_limit, dual_tc


# --------------------------------------------------------------------------
# Host-side (cached) construction of the interpolation matrices.
# --------------------------------------------------------------------------
@functools.lru_cache(maxsize=None)
def _interp_matrix(in_size: int, out_size: int, mode: str) -> np.ndarray:
    """(out_size, in_size) matrix M with  out = M @ in  along one spatial axis.

    Matches torch.nn.functional.interpolate:
      * 'nearest'                                : src = floor(dst * in/out)
      * 'bilinear'/'linear', align_corners=False : half-pixel centres,
        negative source clamped to 0, right edge clamped to in-1.
    """
    M = np.zeros((out_size, in_size), dtype=np.float32)
    scale = in_size / out_size
    if mode == "nearest":
        for o in range(out_size):
            i = min(int(np.floor(o * scale)), in_size - 1)
            M[o, i] = 1.0
    elif mode in ("bilinear", "linear"):
        for o in range(out_size):
            src = (o + 0.5) * scale - 0.5
            if src < 0.0:
                src = 0.0
            i0 = min(int(np.floor(src)), in_size - 1)
            i1 = min(i0 + 1, in_size - 1)
            lam = src - i0
            M[o, i0] += 1.0 - lam
            M[o, i1] += lam
    else:
        raise NotImplementedError(f"mode={mode!r}")
    return M


@functools.lru_cache(maxsize=None)
def _fused_weight(h: int, w: int, h_out: int, w_out: int, mode: str) -> np.ndarray:
    """(H*W, H_out*W_out) fused separable weight:  out2d = x2d @ K."""
    ry = _interp_matrix(h, h_out, mode)      # (H_out, H)
    rx = _interp_matrix(w, w_out, mode)      # (W_out, W)
    return np.ascontiguousarray(np.kron(ry, rx).T)


# --------------------------------------------------------------------------
# Kernels
# --------------------------------------------------------------------------
def _fused_kernel(x_ref, k_ref, o_ref):
    # x_ref: (TILE_BC, H*W)   k_ref: (H*W, TILE_N)   o_ref: (TILE_BC, TILE_N)
    x = x_ref[...]
    k = k_ref[...]
    if k.dtype != x.dtype:                  # e.g. exact bf16 'nearest' weights
        k = k.astype(x.dtype)
    o_ref[...] = jnp.dot(x, k, preferred_element_type=jnp.float32).astype(o_ref.dtype)


def _separable_kernel(x_ref, ry_ref, rxT_ref, o_ref):
    # x_ref: (TILE_BC, H, W)  ry_ref: (H_out, H)  rxT_ref: (W, W_out)
    # o_ref: (TILE_BC, H_out, W_out)
    tile_bc, h, w = x_ref.shape
    h_out = ry_ref.shape[0]
    w_out = rxT_ref.shape[1]
    x = x_ref[...]
    ry = ry_ref[...]
    rxT = rxT_ref[...]
    if ry.dtype != x.dtype:
        ry = ry.astype(x.dtype)
        rxT = rxT.astype(x.dtype)
    # H pass: single batched contraction over the whole channel tile (no serial
    # per-image fori_loop), same pattern as the standard 'bqk,bkd->bqd' einsum.
    ry_b = jnp.broadcast_to(ry, (tile_bc, h_out, h))
    t = jnp.einsum("boh,bhw->bow", ry_b, x, preferred_element_type=jnp.float32)
    # W pass: one big 2-D matmul on the flattened (TILE_BC*H_out, W) slab;
    # W_out >= 128 on this path so the output stores are lane dense.
    out = jnp.dot(t.reshape(tile_bc * h_out, w), rxT,
                  preferred_element_type=jnp.float32)
    o_ref[...] = out.reshape(tile_bc, h_out, w_out).astype(o_ref.dtype)


# --------------------------------------------------------------------------
# Wrapper
# --------------------------------------------------------------------------
def interpolate(x: jax.Array, stride: int, mode: str) -> jax.Array:
    """Pallas equivalent of Interpolate(stride, mode).forward(x); x is NCHW."""
    if mode not in ("nearest", "bilinear", "linear"):
        raise NotImplementedError(mode)

    b, c, h, w = x.shape
    h_out, w_out = h * stride, w * stride

    orig_dtype = x.dtype
    if not jnp.issubdtype(orig_dtype, jnp.floating):
        # TODO(synk): PyTorch rejects integer inputs for bilinear; here we cast
        # f32 -> interpolate -> truncate back (exact for 'nearest').
        x = x.astype(jnp.float32)

    work_budget, vmem_limit, dual_tc = _tpu_budgets()

    bc = b * c
    hw = h * w
    n_out = h_out * w_out
    in_elt = x.dtype.itemsize
    out_elt = x.dtype.itemsize

    # Fused-weight dtype: bf16 is bit-exact for 'nearest' (0/1 weights) and
    # halves K traffic; bilinear coefficients stay f32 unless x is bf16
    # (bf16 coefficients => not bit-identical to PyTorch, accumulation is f32).
    if mode == "nearest":
        w_dtype = jnp.bfloat16
    else:
        w_dtype = jnp.bfloat16 if x.dtype == jnp.bfloat16 else jnp.float32
    w_elt = np.dtype(w_dtype).itemsize

    fused_w_bytes = hw * n_out * w_elt
    # Generation-aware threshold for the single-matmul path.
    use_fused = fused_w_bytes <= ((8 << 20) if dual_tc else (20 << 20))

    if use_fused:
        # --------------------- fused single-matmul path ---------------------
        kmat = jnp.asarray(_fused_weight(h, w, h_out, w_out, mode), dtype=w_dtype)
        x2 = x.reshape(bc, hw)                              # free reshape

        # Output-column tile: keep K fully VMEM-resident (constant index_map,
        # fetched from HBM once) whenever it fits the per-generation cap.
        k_resident_cap = (4 << 20) if dual_tc else (20 << 20)
        if n_out <= _LANE or fused_w_bytes <= k_resident_cap:
            tile_n = n_out
        else:
            tile_n = min(n_out, max(_LANE, _round_down(
                k_resident_cap // (hw * w_elt), _LANE)))

        # Channel tile, with full VMEM accounting: double-buffered x and out
        # tiles + the f32 matmul intermediate + the (double-buffered) K tile.
        k_buf_bytes = 2 * hw * tile_n * w_elt
        per_bc = 2 * hw * in_elt + 2 * tile_n * out_elt + tile_n * 4
        avail = max(work_budget - k_buf_bytes, per_bc * _SUBLANE)
        if bc <= _SUBLANE:
            tile_bc = bc
        else:
            tile_bc = min(bc, max(_SUBLANE, _round_down(avail // per_bc, _SUBLANE)))

        # v7x megacore: guarantee >= 2 parallel grid steps. Prefer splitting
        # the channel axis (keeps K resident and output full-lane-width); only
        # split columns when the channel axis cannot be split.
        if dual_tc and tile_bc >= bc and tile_n >= n_out:
            if bc > _SUBLANE:
                tile_bc = _round_up((bc + 1) // 2, _SUBLANE)
            elif n_out >= 2 * _LANE:
                tile_n = _round_up((n_out + 1) // 2, _LANE)

        if tile_n == n_out:
            grid = (pl.cdiv(bc, tile_bc),)
            in_specs = [pl.BlockSpec((tile_bc, hw), lambda i: (i, 0)),
                        pl.BlockSpec((hw, n_out), lambda i: (0, 0))]
            out_spec = pl.BlockSpec((tile_bc, n_out), lambda i: (i, 0))
            dims = ("parallel",)
        else:
            grid = (pl.cdiv(bc, tile_bc), pl.cdiv(n_out, tile_n))
            in_specs = [pl.BlockSpec((tile_bc, hw), lambda i, j: (i, 0)),
                        pl.BlockSpec((hw, tile_n), lambda i, j: (0, j))]
            out_spec = pl.BlockSpec((tile_bc, tile_n), lambda i, j: (i, j))
            dims = ("parallel", "parallel")

        out = pl.pallas_call(
            _fused_kernel,
            out_shape=jax.ShapeDtypeStruct((bc, n_out), x.dtype),
            grid_spec=pltpu.PrefetchScalarGridSpec(
                num_scalar_prefetch=0,
                grid=grid,
                in_specs=in_specs,
                out_specs=out_spec,
            ),
            compiler_params=pltpu.CompilerParams(
                dimension_semantics=dims,
                vmem_limit_bytes=vmem_limit,
            ),
        )(x2, kmat)
        out = out.reshape(b, c, h_out, w_out)               # free reshape
    else:
        # ------------------ separable fallback (large maps) -----------------
        wf_dtype = jnp.bfloat16 if x.dtype == jnp.bfloat16 else jnp.float32
        ry = jnp.asarray(_interp_matrix(h, h_out, mode), dtype=wf_dtype)
        rxT = jnp.asarray(
            np.ascontiguousarray(_interp_matrix(w, w_out, mode).T), dtype=wf_dtype)
        x3 = x.reshape(bc, h, w)

        # Per-row VMEM: double-buffered x/out tiles + broadcast Ry + f32
        # H-pass intermediate + f32 pre-cast output.
        per_bc = (2 * h * w * in_elt + 2 * h_out * w_out * out_elt
                  + h_out * h * 4 + h_out * w * 4 + h_out * w_out * 4)
        tile_bc = max(1, min(bc, work_budget // per_bc))
        if tile_bc >= _SUBLANE:
            tile_bc = _round_down(tile_bc, _SUBLANE)        # sublane-friendly
        if dual_tc and tile_bc >= bc and bc >= 2:
            tile_bc = (bc + 1) // 2                         # keep both TCs busy
        # TODO(synk): consider pipeline_mode=pl.Buffered(3) on x if profiling
        # shows exposed DMA on this (rare) large-feature-map path.
        grid = (pl.cdiv(bc, tile_bc),)
        out = pl.pallas_call(
            _separable_kernel,
            out_shape=jax.ShapeDtypeStruct((bc, h_out, w_out), x.dtype),
            grid_spec=pltpu.PrefetchScalarGridSpec(
                num_scalar_prefetch=0,
                grid=grid,
                in_specs=[
                    pl.BlockSpec((tile_bc, h, w), lambda i: (i, 0, 0)),
                    pl.BlockSpec((h_out, h), lambda i: (0, 0)),
                    pl.BlockSpec((w, w_out), lambda i: (0, 0)),
                ],
                out_specs=pl.BlockSpec((tile_bc, h_out, w_out),
                                       lambda i: (i, 0, 0)),
            ),
            compiler_params=pltpu.CompilerParams(
                dimension_semantics=("parallel",),
                vmem_limit_bytes=vmem_limit,
            ),
        )(x3, ry, rxT)
        out = out.reshape(b, c, h_out, w_out)

    if out.dtype != orig_dtype:
        out = out.astype(orig_dtype)
    return out


if __name__ == "__main__":
    key = jax.random.PRNGKey(0)
    # Small NCHW input consistent with the module's forward.
    x = jax.random.normal(key, (2, 4, 16, 16), dtype=jnp.float32)
    stride = 2

    # 'bilinear' is the faithful setting (the module passes align_corners=False).
    y = interpolate(x, stride=stride, mode="bilinear")
    jax.block_until_ready(y)
    assert y.shape == (2, 4, 32, 32), y.shape

    # 'nearest' also supported (align_corners ignored for nearest).
    y2 = interpolate(x, stride=stride, mode="nearest")
    jax.block_until_ready(y2)
    assert y2.shape == (2, 4, 32, 32), y2.shape

    # Light semantic checks.
    xn = np.asarray(x)
    # Nearest with integer stride replicates pixels: out[2i, 2j] == x[i, j].
    assert np.allclose(np.asarray(y2)[:, :, ::2, ::2], xn)
    # Bilinear, align_corners=False: the top-left corner is an exact copy.
    assert np.allclose(np.asarray(y)[:, :, 0, 0], xn[:, :, 0, 0], atol=1e-5)

    print("KERNEL_OK")
</pallas_src>

<mosaic_0001>
module attributes {stable_mosaic.version = 11 : i64} {
  func.func @_fused_kernel(%arg0: i32, %arg1: i32, %arg2: memref<8x256xf32, #tpu.memory_space<vmem>>, %arg3: memref<256x512xf32, #tpu.memory_space<vmem>>, %arg4: memref<8x512xf32, #tpu.memory_space<vmem>>) attributes {dimension_semantics = [#tpu.dimension_semantics<parallel>, #tpu.dimension_semantics<parallel>], iteration_bounds = array<i64: 1, 2>, scalar_prefetch = 0 : i64, scratch_operands = 0 : i64, tpu.core_type = #tpu.core_type<tc>, window_params = [{transform_indices = @transform_0, window_bounds = array<i64: 8, 256>}, {transform_indices = @transform_1, window_bounds = array<i64: 256, 512>}, {transform_indices = @transform_2, window_bounds = array<i64: 8, 512>}]} {
    %c0 = arith.constant 0 : index
    %c0_0 = arith.constant 0 : index
    %0 = vector.load %arg2[%c0, %c0_0] : memref<8x256xf32, #tpu.memory_space<vmem>>, vector<8x256xf32>
    %c0_1 = arith.constant 0 : index
    %c0_2 = arith.constant 0 : index
    %1 = vector.load %arg3[%c0_1, %c0_2] : memref<256x512xf32, #tpu.memory_space<vmem>>, vector<256x512xf32>
    %cst = arith.constant dense<0.000000e+00> : vector<8x512xf32>
    %2 = tpu.matmul %0, %1, %cst {dimension_numbers = #tpu.dot_dimension_numbers<[1], [0], [0], [1], [0, 0, 1, 1], [], []>} : vector<8x256xf32>, vector<256x512xf32>, vector<8x512xf32> -> vector<8x512xf32>
    %c0_3 = arith.constant 0 : index
    %c0_4 = arith.constant 0 : index
    %3 = vector.load %arg4[%c0_3, %c0_4] : memref<8x512xf32, #tpu.memory_space<vmem>>, vector<8x512xf32>
    tpu.vector_store %arg4[%c0_3, %c0_4], %2 {strides = array<i32>} : memref<8x512xf32, #tpu.memory_space<vmem>>, vector<8x512xf32>,
    return
  }
  func.func @transform_0(%arg0: i32, %arg1: i32) -> (i32, i32) {
    %c0_i32 = arith.constant 0 : i32
    %c0_i32_0 = arith.constant 0 : i32
    return %arg0, %c0_i32 : i32, i32
  }
  func.func @transform_1(%arg0: i32, %arg1: i32) -> (i32, i32) {
    %c0_i32 = arith.constant 0 : i32
    %c0_i32_0 = arith.constant 0 : i32
    return %c0_i32, %arg1 : i32, i32
  }
  func.func @transform_2(%arg0: i32, %arg1: i32) -> (i32, i32) {
    %c0_i32 = arith.constant 0 : i32
    return %arg0, %arg1 : i32, i32
  }
}

</mosaic_0001>

<bundles_post_ra>
// kernel: tpu_custom_call.1
= control target key start
LH: loop header
LB: loop body
LE: loop exit
PB: predicated region body
PF: predicated region fallthrough
CT: control target
= control target key end

     0   :  { %7 = vsyncpa [#allocation3], 0  ;;  %s1149_s0 = inlined_call_operand.hbm [shape: f32[8,256], index: 0, kind: input, shape index: {}]   ;;  %s1150_s1 = inlined_call_operand.hbm [shape: f32[256,1024], index: 1, kind: input, shape index: {}]   ;;  %s1151_s2 = inlined_call_operand.hbm [shape: f32[8,1024], index: 2, kind: output, shape index: {}]  }
   0x1   :  { %8 = vsyncpa [#allocation6], 0 }
   0x2   :  { %10 = vsyncpa [#allocation6 + $0x1], 0 }
   0x3   :  { %11 = vsyncpa [#allocation4], 0 }
   0x4   :  { %13 = vsyncpa [#allocation4 + $0x1], 0  ;;  %s843_s9 = smov 0   ;;  %s845_s10 = smov 0  }
   0x5   :  { %s847_s11 = smov 0   ;;  %s849_s12 = smov 0  }
   0x6   :  { %s851_s13 = smov 0   ;;  %s853_s14 = smov 0  }
   0x7 LB: > { %s587_s15 = sadd.s32 4294967295, %s820_s14   ;;  %s588_s16 = sadd.s32 4294967294, %s820_s14   ;;  %s820_s14 = sphi %s853_s14, %s19_s14   ;;  %s816_s13 = sphi %s851_s13, %s1170_s13   ;;  %s812_s12 = sphi %s849_s12, %s1169_s12   ;;  %s808_s11 = sphi %s847_s11, %s1168_s11   ;;  %s804_s10 = sphi %s845_s10, %s1167_s10   ;;  %s800_s9 = sphi %s843_s9, %s1166_s9  }
   0x8   : > { %s64_s17 = sadd.s32 1, %s808_s11  ;;  %p71_p0 = scmp.ne.s32.totalorder %s808_s11, %s804_s10 }
   0x9   : > { %p72_p1 = scmp.eq.s32.totalorder %s820_s14, 0  ;;  %p77_p2 = scmp.ne.s32.totalorder %s804_s10, %s800_s9 }
   0xa   : > { %p881_p3 = scmp.eq.s32.totalorder %s587_s15, 0  ;;  %p103_p4 = scmp.eq.s32.totalorder %s587_s15, 1 }
   0xb   : > { %p885_p5 = por %p72_p1, %p71_p0  ;;  %p109_p6 = scmp.eq.s32.totalorder %s588_s16, 1 }
   0xc   : > { %p891_p7 = por %p881_p3, %p77_p2  ;;  %p895_p8 = por %p103_p4, %p71_p0 }
   0xd   : > { %p899_p9 = por %p109_p6, %p77_p2  ;;  %p589_p10 = scmp.ge.s32.totalorder %s820_s14, 1 }
   0xe   : > { %s1156_s20 = scalar_select %p891_p7, 1, 0 }
   0xf   : > { %s1157_s21 = scalar_select %p895_p8, 1, 0 }
  0x10   : > { %s1158_s22 = scalar_select %p899_p9, 1, 0 }
  0x11   : > { %p116_p11 = scmp.lt.s32.totalorder %s820_s14, 3  ;;  %s822_s24 = smov [#allocation2]  }
  0x12   : > { %s132_s25 = sshll.u32 %s822_s24, 4  ;;  %p627_p1 = scmp.lt.s32.totalorder %s820_s14, 2  ;;  %s133_s25 = int_to_ptr.vmem [resolvable:$true] %s132_s25 }
  0x13   : > { %p906_p13 = pnand %p589_p10, %p116_p11  ;;  %s28_s28 = sadd.s32 1, %s816_s13 }
  0x14   : > { %p915_p4 = pnand %p627_p1, %p885_p5  ;;  %p29_p6 = scmp.ge.s32.totalorder %s28_s28, 2 }
  0x15   : > { %p614_p0 = pneg %p906_p13  ;;  %s143_s29 = sand.u32 1, %s808_s11  }
  0x16   : > { %s693_s30 = scalar_lea.vmem %s133_s25, 256  ;;  %p701_p8 = scmp.lt.s32.totalorder %s133_s25, %s133_s25 }
  0x17   : > { %p921_p2 = pnand %p614_p0, %p881_p3  ;;  %p694_p11 = scmp.ne.s32.totalorder %s133_s25, %s693_s30 }
  0x18   : > { %p702_p5 = scmp.lt.s32.totalorder %s693_s30, %s693_s30 }
  0x19   : > { %p684_p10 = pneg %p921_p2 }
  0x1a   : > { %p703_p1 = por %p702_p5, %p701_p8 }
  0x1b   : > { %p696_p12 = pnand %p694_p11, %p684_p10 }
  0x1d   : > { %p697_p9 = pneg %p696_p12 }
  0x1f   : > { %p704_p7 = pnand %p703_p1, %p697_p9 }
  0x21   : > { %707 = shalt.err (!%p704_p7)
}
  0x22   : > { %617 = dma.hbm_to_vmem [thread:$0]  (!%p921_p2), %s1149_s0, 256, %s133_s25, [#allocation3]  }
  0x23   : > { %s1172_s28 = smov (%p29_p6, %s28_s28), 0  ;;  %s592_s5 = sshll.u32 %s143_s29, 10 }
  0x24   : > { %s61_s6 = ssub.s32 %s816_s13, %s1172_s28  ;;  %s604_s7 = sshll.u32 %s816_s13, 9 }
  0x25   : > { %p62_p12 = scmp.eq.s32.totalorder %s61_s6, 0  ;;  %s153_s16 = scalar_lea.hbm %s1150_s1, %s604_s7 }
  0x26   : > { %s147_s19 = scalar_lea.vmem [#allocation5], %s592_s5  ;;  %s144_s30 = scalar_lea.sflag [#allocation6], %s143_s29 }
  0x27   : > { %s154_s24 = sshll.u32 %s147_s19, 4  ;;  %p710_p7 = pneg %p915_p4  ;;  %s155_s24 = int_to_ptr.vmem [resolvable:$true] %s154_s24 }
  0x28   : > { %s945_s27 = scalar_select %p62_p12, %s808_s11, %s64_s17  }
  0x29   : > { %s721_s25 = scalar_lea.vmem %s155_s24, 16384  ;;  %s823_s3 = smov [#allocation5]  }
  0x2a   : > { %p722_p8 = scmp.ne.s32.totalorder %s155_s24, %s721_s25  ;;  %s726_s4 = sshll.u32 %s823_s3, 4  ;;  %s727_s4 = int_to_ptr.vmem [resolvable:$false] %s726_s4 }
  0x2b   : > { %s728_s6 = scalar_lea.vmem %s727_s4, 32768  ;;  %p729_p2 = scmp.lt.s32.totalorder %s155_s24, %s727_s4 }
  0x2c   : > { %p724_p9 = pnand %p722_p8, %p710_p7  ;;  %p730_p6 = scmp.lt.s32.totalorder %s728_s6, %s721_s25 }
  0x2e   : > { %p725_p0 = pneg %p724_p9  ;;  %p731_p10 = por %p730_p6, %p729_p2 }
  0x30   : > { %p732_p11 = pnand %p731_p10, %p725_p0 }
  0x32   : > { %735 = shalt.err (!%p732_p11)
}
  0x33   : > { %s824_s5 = smov 1024   ;;  %s825_s17 = smov 512  }
  0x34   : > { %s826_s7 = smov 32   ;;  %166 = sbr.rel (%p906_p13) target bundleno = 336 (0x150), region = 28 }
  0x35   : > { %621 = dma.hbm_to_vmem [thread:$0]  (!%p915_p4), %s153_s16, 16384, %s155_s24, %s144_s30, %s824_s5, %s825_s17, %s826_s7  }
  0x39   : > { %787 = dma.done.wait (%p881_p3), [#allocation3], 256  }
  0x3a   : > { %789 = vsyncadd (%p881_p3), [#allocation3], 4294967040  ;;  %s958_s29 = sand.u32 1, %s804_s10   ;;  %p1162_p4 = scmp.ne.s32.totalorder %s1156_s20, 0 }
  0x3b   : > { %s597_s8 = sshll.u32 %s958_s29, 10  ;;  %s173_s15 = scalar_lea.sflag [#allocation6], %s958_s29 }
  0x3c   : > { %s962_s19 = scalar_lea.vmem [#allocation5], %s597_s8 }
  0x3d   : > { %791 = dma.done.wait (%p1162_p4), %s173_s15, 16384  }
  0x3e   : > { %793 = vsyncadd (%p1162_p4), %s173_s15, 4294950912  ;;  %v262_v0 = vld [vmem:[%s962_s19 + $0x1e8] sm:$0xff]  ;;  %v264_v1 = vld [vmem:[%s962_s19 + $0x1f8] sm:$0xff]  ;;  %s598_s18 = sshll.u32 %s958_s29, 5  ;;  %s605_s26 = sshll.u32 %s812_s12, 9 }
  0x3f   : > { %v261_v2 = vld [vmem:[%s962_s19 + $0x1e0] sm:$0xff]  ;;  %329 = vmatprep.subr.mxu0 %v262_v0  ;;  %400 = vmatprep.subr.mxu1 %v264_v1  ;;  %v263_v3 = vld [vmem:[%s962_s19 + $0x1f0] sm:$0xff]  ;;  %v258_v4 = vld [vmem:[%s962_s19 + $0x1c8] sm:$0xff]  ;;  %s196_s20 = scalar_lea.vmem [#allocation7], %s598_s18  ;;  %s1103_s30 = scalar_lea.hbm %s1151_s2, %s605_s26 }
  0x40   : > { %v260_v5 = vld [vmem:[%s962_s19 + $0x1d8] sm:$0xff]  ;;  %330 = vmatpush1.msra.mxu0 %v261_v2  ;;  %401 = vmatpush1.msra.mxu1 %v263_v3  ;;  %v257_v6 = vld [vmem:[%s962_s19 + $0x1c0] sm:$0xff]  ;;  %v259_v7 = vld [vmem:[%s962_s19 + $0x1d0] sm:$0xff]  ;;  %s492_s23 = sshll.u32 %s196_s20, 4  ;;  %s476_s25 = scalar_lea.sflag [#allocation4], %s958_s29  ;;  %s1098_s23 = int_to_ptr.vmem [resolvable:$true] %s492_s23 }
  0x41   : > { %v254_v8 = vld [vmem:[%s962_s19 + $0x1a8] sm:$0xff]  ;;  %331 = vmatprep.subr.mxu0 %v258_v4  ;;  %402 = vmatprep.subr.mxu1 %v260_v5  ;;  %v256_v9 = vld [vmem:[%s962_s19 + $0x1b8] sm:$0xff]  ;;  %v253_v10 = vld [vmem:[%s962_s19 + $0x1a0] sm:$0xff]  ;;  %s736_s12 = scalar_lea.vmem %s1098_s23, 512  ;;  %p1163_p13 = scmp.ne.s32.totalorder %s1157_s21, 0 }
  0x42   : > { %v255_v11 = vld [vmem:[%s962_s19 + $0x1b0] sm:$0xff]  ;;  %332 = vmatpush1.msra.mxu0 %v257_v6  ;;  %403 = vmatpush1.msra.mxu1 %v259_v7  ;;  %v250_v12 = vld [vmem:[%s962_s19 + $0x188] sm:$0xff]  ;;  %v252_v13 = vld [vmem:[%s962_s19 + $0x198] sm:$0xff]  ;;  %p737_p3 = scmp.ne.s32.totalorder %s1098_s23, %s736_s12  ;;  %s827_s3 = smov [#allocation7]  }
  0x43   : > { %333 = vmatprep.subr.mxu0 %v254_v8  ;;  %404 = vmatprep.subr.mxu1 %v256_v9  ;;  %v249_v14 = vld [vmem:[%s962_s19 + $0x180] sm:$0xff]  ;;  %v251_v15 = vld [vmem:[%s962_s19 + $0x190] sm:$0xff]  ;;  %v246_v16 = vld [vmem:[%s962_s19 + $0x168] sm:$0xff]  ;;  %s740_s4 = sshll.u32 %s827_s3, 4  ;;  %s741_s4 = int_to_ptr.vmem [resolvable:$false] %s740_s4 }
  0x44   : > { %334 = vmatpush1.msra.mxu0 %v253_v10  ;;  %405 = vmatpush1.msra.mxu1 %v255_v11  ;;  %v248_v17 = vld [vmem:[%s962_s19 + $0x178] sm:$0xff]  ;;  %v245_v18 = vld [vmem:[%s962_s19 + $0x160] sm:$0xff]  ;;  %v247_v19 = vld [vmem:[%s962_s19 + $0x170] sm:$0xff]  ;;  %p738_p5 = pnand %p737_p3, %p1163_p13  ;;  %s742_s6 = scalar_lea.vmem %s741_s4, 1024 }
  0x45   : > { %335 = vmatprep.subr.mxu0 %v250_v12  ;;  %406 = vmatprep.subr.mxu1 %v252_v13  ;;  %v242_v20 = vld [vmem:[%s962_s19 + $0x148] sm:$0xff]  ;;  %v244_v21 = vld [vmem:[%s962_s19 + $0x158] sm:$0xff]  ;;  %v241_v22 = vld [vmem:[%s962_s19 + $0x140] sm:$0xff]  ;;  %p743_p12 = scmp.lt.s32.totalorder %s1098_s23, %s741_s4  ;;  %p744_p7 = scmp.lt.s32.totalorder %s742_s6, %s736_s12 }
  0x46   : > { %336 = vmatpush1.msra.mxu0 %v249_v14  ;;  %407 = vmatpush1.msra.mxu1 %v251_v15  ;;  %v243_v23 = vld [vmem:[%s962_s19 + $0x150] sm:$0xff]  ;;  %v238_v24 = vld [vmem:[%s962_s19 + $0x128] sm:$0xff]  ;;  %v240_v25 = vld [vmem:[%s962_s19 + $0x138] sm:$0xff]  ;;  %p739_p1 = pneg %p738_p5 }
  0x47   : > { %337 = vmatprep.subr.mxu0 %v246_v16  ;;  %408 = vmatprep.subr.mxu1 %v248_v17  ;;  %v237_v26 = vld [vmem:[%s962_s19 + $0x120] sm:$0xff]  ;;  %v239_v27 = vld [vmem:[%s962_s19 + $0x130] sm:$0xff]  ;;  %v234_v28 = vld [vmem:[%s962_s19 + $0x108] sm:$0xff]  ;;  %p745_p8 = por %p744_p7, %p743_p12 }
  0x48   : > { %338 = vmatpush1.msra.mxu0 %v245_v18  ;;  %409 = vmatpush1.msra.mxu1 %v247_v19  ;;  %v236_v29 = vld [vmem:[%s962_s19 + $0x118] sm:$0xff]  ;;  %v233_v30 = vld [vmem:[%s962_s19 + $0x100] sm:$0xff]  ;;  %v235_v31 = vld [vmem:[%s962_s19 + $0x110] sm:$0xff] }
  0x49   : > { %339 = vmatprep.subr.mxu0 %v242_v20  ;;  %410 = vmatprep.subr.mxu1 %v244_v21  ;;  %v230_v32 = vld [vmem:[%s962_s19 + $0xe8] sm:$0xff]  ;;  %v232_v33 = vld [vmem:[%s962_s19 + $0xf8] sm:$0xff]  ;;  %v229_v34 = vld [vmem:[%s962_s19 + $0xe0] sm:$0xff]  ;;  %p746_p9 = pnand %p745_p8, %p739_p1 }
  0x4a   : > { %340 = vmatpush1.msra.mxu0 %v241_v22  ;;  %411 = vmatpush1.msra.mxu1 %v243_v23  ;;  %v231_v35 = vld [vmem:[%s962_s19 + $0xf0] sm:$0xff]  ;;  %v226_v36 = vld [vmem:[%s962_s19 + $0xc8] sm:$0xff]  ;;  %v228_v37 = vld [vmem:[%s962_s19 + $0xd8] sm:$0xff] }
  0x4b   : > { %341 = vmatprep.subr.mxu0 %v238_v24  ;;  %412 = vmatprep.subr.mxu1 %v240_v25  ;;  %v225_v38 = vld [vmem:[%s962_s19 + $0xc0] sm:$0xff]  ;;  %v227_v39 = vld [vmem:[%s962_s19 + $0xd0] sm:$0xff]  ;;  %v222_v40 = vld [vmem:[%s962_s19 + $0xa8] sm:$0xff] }
  0x4c   : > { %342 = vmatpush1.msra.mxu0 %v237_v26  ;;  %413 = vmatpush1.msra.mxu1 %v239_v27  ;;  %v224_v41 = vld [vmem:[%s962_s19 + $0xb8] sm:$0xff]  ;;  %v221_v42 = vld [vmem:[%s962_s19 + $0xa0] sm:$0xff]  ;;  %v223_v43 = vld [vmem:[%s962_s19 + $0xb0] sm:$0xff] }
  0x4d   : > { %343 = vmatprep.subr.mxu0 %v234_v28  ;;  %414 = vmatprep.subr.mxu1 %v236_v29  ;;  %v218_v44 = vld [vmem:[%s962_s19 + $0x88] sm:$0xff]  ;;  %v220_v45 = vld [vmem:[%s962_s19 + $0x98] sm:$0xff]  ;;  %v217_v46 = vld [vmem:[%s962_s19 + $0x80] sm:$0xff] }
  0x4e   : > { %344 = vmatpush1.msra.mxu0 %v233_v30  ;;  %415 = vmatpush1.msra.mxu1 %v235_v31  ;;  %v219_v47 = vld [vmem:[%s962_s19 + $0x90] sm:$0xff]  ;;  %v214_v48 = vld [vmem:[%s962_s19 + $0x68] sm:$0xff]  ;;  %v216_v49 = vld [vmem:[%s962_s19 + $0x78] sm:$0xff] }
  0x4f   : > { %345 = vmatprep.subr.mxu0 %v230_v32  ;;  %416 = vmatprep.subr.mxu1 %v232_v33  ;;  %v213_v50 = vld [vmem:[%s962_s19 + $0x60] sm:$0xff]  ;;  %v215_v51 = vld [vmem:[%s962_s19 + $0x70] sm:$0xff]  ;;  %v210_v52 = vld [vmem:[%s962_s19 + $0x48] sm:$0xff] }
  0x50   : > { %346 = vmatpush1.msra.mxu0 %v229_v34  ;;  %417 = vmatpush1.msra.mxu1 %v231_v35  ;;  %v212_v53 = vld [vmem:[%s962_s19 + $0x58] sm:$0xff]  ;;  %v209_v54 = vld [vmem:[%s962_s19 + $0x40] sm:$0xff]  ;;  %v211_v55 = vld [vmem:[%s962_s19 + $0x50] sm:$0xff] }
  0x51   : > { %347 = vmatprep.subr.mxu0 %v226_v36  ;;  %418 = vmatprep.subr.mxu1 %v228_v37  ;;  %v206_v56 = vld [vmem:[%s962_s19 + $0x28] sm:$0xff]  ;;  %v208_v57 = vld [vmem:[%s962_s19 + $0x38] sm:$0xff]  ;;  %v205_v58 = vld [vmem:[%s962_s19 + $0x20] sm:$0xff] }
  0x52   : > { %348 = vmatpush1.msra.mxu0 %v225_v38  ;;  %419 = vmatpush1.msra.mxu1 %v227_v39  ;;  %v207_v59 = vld [vmem:[%s962_s19 + $0x30] sm:$0xff]  ;;  %v202_v60 = vld [vmem:[%s962_s19 + $0x8] sm:$0xff]  ;;  %v204_v61 = vld [vmem:[%s962_s19 + $0x18] sm:$0xff] }
  0x53   : > { %349 = vmatprep.subr.mxu0 %v222_v40  ;;  %420 = vmatprep.subr.mxu1 %v224_v41  ;;  %v201_v62 = vld [vmem:[%s962_s19] sm:$0xff]  ;;  %v203_v63 = vld [vmem:[%s962_s19 + $0x10] sm:$0xff]  ;;  %v326_v0 = vld [vmem:[%s962_s19 + $0x3e8] sm:$0xff] }
  0x54   : > { %350 = vmatpush1.msra.mxu0 %v221_v42  ;;  %421 = vmatpush1.msra.mxu1 %v223_v43  ;;  %v328_v1 = vld [vmem:[%s962_s19 + $0x3f8] sm:$0xff]  ;;  %v325_v2 = vld [vmem:[%s962_s19 + $0x3e0] sm:$0xff]  ;;  %v327_v3 = vld [vmem:[%s962_s19 + $0x3f0] sm:$0xff] }
  0x55   : > { %351 = vmatprep.subr.mxu0 %v218_v44  ;;  %422 = vmatprep.subr.mxu1 %v220_v45  ;;  %v322_v4 = vld [vmem:[%s962_s19 + $0x3c8] sm:$0xff]  ;;  %v324_v5 = vld [vmem:[%s962_s19 + $0x3d8] sm:$0xff]  ;;  %v321_v6 = vld [vmem:[%s962_s19 + $0x3c0] sm:$0xff] }
  0x56   : > { %352 = vmatpush1.msra.mxu0 %v217_v46  ;;  %423 = vmatpush1.msra.mxu1 %v219_v47  ;;  %v323_v7 = vld [vmem:[%s962_s19 + $0x3d0] sm:$0xff]  ;;  %v318_v8 = vld [vmem:[%s962_s19 + $0x3a8] sm:$0xff]  ;;  %v320_v9 = vld [vmem:[%s962_s19 + $0x3b8] sm:$0xff] }
  0x57   : > { %353 = vmatprep.subr.mxu0 %v214_v48  ;;  %424 = vmatprep.subr.mxu1 %v216_v49  ;;  %v317_v10 = vld [vmem:[%s962_s19 + $0x3a0] sm:$0xff]  ;;  %v319_v11 = vld [vmem:[%s962_s19 + $0x3b0] sm:$0xff]  ;;  %v314_v12 = vld [vmem:[%s962_s19 + $0x388] sm:$0xff] }
  0x58   : > { %354 = vmatpush1.msra.mxu0 %v213_v50  ;;  %425 = vmatpush1.msra.mxu1 %v215_v51  ;;  %v316_v13 = vld [vmem:[%s962_s19 + $0x398] sm:$0xff]  ;;  %v313_v14 = vld [vmem:[%s962_s19 + $0x380] sm:$0xff]  ;;  %v315_v15 = vld [vmem:[%s962_s19 + $0x390] sm:$0xff] }
  0x59   : > { %355 = vmatprep.subr.mxu0 %v210_v52  ;;  %426 = vmatprep.subr.mxu1 %v212_v53  ;;  %v310_v16 = vld [vmem:[%s962_s19 + $0x368] sm:$0xff]  ;;  %v312_v17 = vld [vmem:[%s962_s19 + $0x378] sm:$0xff]  ;;  %v309_v18 = vld [vmem:[%s962_s19 + $0x360] sm:$0xff] }
  0x5a   : > { %356 = vmatpush1.msra.mxu0 %v209_v54  ;;  %427 = vmatpush1.msra.mxu1 %v211_v55  ;;  %v311_v19 = vld [vmem:[%s962_s19 + $0x370] sm:$0xff]  ;;  %v306_v20 = vld [vmem:[%s962_s19 + $0x348] sm:$0xff]  ;;  %v308_v21 = vld [vmem:[%s962_s19 + $0x358] sm:$0xff] }
  0x5b   : > { %357 = vmatprep.subr.mxu0 %v206_v56  ;;  %428 = vmatprep.subr.mxu1 %v208_v57  ;;  %v305_v22 = vld [vmem:[%s962_s19 + $0x340] sm:$0xff]  ;;  %v307_v23 = vld [vmem:[%s962_s19 + $0x350] sm:$0xff]  ;;  %v302_v24 = vld [vmem:[%s962_s19 + $0x328] sm:$0xff] }
  0x5c   : > { %358 = vmatpush1.msra.mxu0 %v205_v58  ;;  %429 = vmatpush1.msra.mxu1 %v207_v59  ;;  %v304_v25 = vld [vmem:[%s962_s19 + $0x338] sm:$0xff]  ;;  %v301_v26 = vld [vmem:[%s962_s19 + $0x320] sm:$0xff]  ;;  %v303_v27 = vld [vmem:[%s962_s19 + $0x330] sm:$0xff] }
  0x5d   : > { %359 = vmatprep.subr.mxu0 %v202_v60  ;;  %430 = vmatprep.subr.mxu1 %v204_v61  ;;  %v298_v28 = vld [vmem:[%s962_s19 + $0x308] sm:$0xff]  ;;  %v300_v29 = vld [vmem:[%s962_s19 + $0x318] sm:$0xff]  ;;  %v297_v30 = vld [vmem:[%s962_s19 + $0x300] sm:$0xff] }
  0x5e   : > { %360 = vmatpush1.msra.mxu0 %v201_v62  ;;  %431 = vmatpush1.msra.mxu1 %v203_v63  ;;  %v299_v31 = vld [vmem:[%s962_s19 + $0x310] sm:$0xff]  ;;  %v294_v32 = vld [vmem:[%s962_s19 + $0x2e8] sm:$0xff]  ;;  %v296_v33 = vld [vmem:[%s962_s19 + $0x2f8] sm:$0xff] }
  0x5f   : > { %361 = vmatprep.subr.mxu0 %v326_v0  ;;  %432 = vmatprep.subr.mxu1 %v328_v1  ;;  %v293_v34 = vld [vmem:[%s962_s19 + $0x2e0] sm:$0xff]  ;;  %v295_v35 = vld [vmem:[%s962_s19 + $0x2f0] sm:$0xff]  ;;  %v290_v36 = vld [vmem:[%s962_s19 + $0x2c8] sm:$0xff] }
  0x60   : > { %362 = vmatpush2.msra.mxu0 %v325_v2  ;;  %433 = vmatpush2.msra.mxu1 %v327_v3  ;;  %v292_v37 = vld [vmem:[%s962_s19 + $0x2d8] sm:$0xff]  ;;  %v289_v38 = vld [vmem:[%s962_s19 + $0x2c0] sm:$0xff]  ;;  %v291_v39 = vld [vmem:[%s962_s19 + $0x2d0] sm:$0xff] }
  0x61   : > { %363 = vmatprep.subr.mxu0 %v322_v4  ;;  %434 = vmatprep.subr.mxu1 %v324_v5  ;;  %v286_v40 = vld [vmem:[%s962_s19 + $0x2a8] sm:$0xff]  ;;  %v288_v41 = vld [vmem:[%s962_s19 + $0x2b8] sm:$0xff]  ;;  %v285_v42 = vld [vmem:[%s962_s19 + $0x2a0] sm:$0xff] }
  0x62   : > { %364 = vmatpush2.msra.mxu0 %v321_v6  ;;  %435 = vmatpush2.msra.mxu1 %v323_v7  ;;  %v287_v43 = vld [vmem:[%s962_s19 + $0x2b0] sm:$0xff]  ;;  %v282_v44 = vld [vmem:[%s962_s19 + $0x288] sm:$0xff]  ;;  %v284_v45 = vld [vmem:[%s962_s19 + $0x298] sm:$0xff] }
  0x63   : > { %365 = vmatprep.subr.mxu0 %v318_v8  ;;  %436 = vmatprep.subr.mxu1 %v320_v9  ;;  %v281_v46 = vld [vmem:[%s962_s19 + $0x280] sm:$0xff]  ;;  %v283_v47 = vld [vmem:[%s962_s19 + $0x290] sm:$0xff]  ;;  %v278_v48 = vld [vmem:[%s962_s19 + $0x268] sm:$0xff] }
  0x64   : > { %366 = vmatpush2.msra.mxu0 %v317_v10  ;;  %437 = vmatpush2.msra.mxu1 %v319_v11  ;;  %v280_v49 = vld [vmem:[%s962_s19 + $0x278] sm:$0xff]  ;;  %v277_v50 = vld [vmem:[%s962_s19 + $0x260] sm:$0xff]  ;;  %v279_v51 = vld [vmem:[%s962_s19 + $0x270] sm:$0xff] }
  0x65   : > { %367 = vmatprep.subr.mxu0 %v314_v12  ;;  %438 = vmatprep.subr.mxu1 %v316_v13  ;;  %v274_v52 = vld [vmem:[%s962_s19 + $0x248] sm:$0xff]  ;;  %v276_v53 = vld [vmem:[%s962_s19 + $0x258] sm:$0xff]  ;;  %v273_v54 = vld [vmem:[%s962_s19 + $0x240] sm:$0xff] }
  0x66   : > { %368 = vmatpush2.msra.mxu0 %v313_v14  ;;  %439 = vmatpush2.msra.mxu1 %v315_v15  ;;  %v275_v55 = vld [vmem:[%s962_s19 + $0x250] sm:$0xff]  ;;  %v270_v56 = vld [vmem:[%s962_s19 + $0x228] sm:$0xff]  ;;  %v272_v57 = vld [vmem:[%s962_s19 + $0x238] sm:$0xff] }
  0x67   : > { %369 = vmatprep.subr.mxu0 %v310_v16  ;;  %440 = vmatprep.subr.mxu1 %v312_v17  ;;  %v269_v58 = vld [vmem:[%s962_s19 + $0x220] sm:$0xff]  ;;  %v271_v59 = vld [vmem:[%s962_s19 + $0x230] sm:$0xff]  ;;  %v266_v60 = vld [vmem:[%s962_s19 + $0x208] sm:$0xff] }
  0x68   : > { %370 = vmatpush2.msra.mxu0 %v309_v18  ;;  %441 = vmatpush2.msra.mxu1 %v311_v19  ;;  %v268_v61 = vld [vmem:[%s962_s19 + $0x218] sm:$0xff]  ;;  %v265_v62 = vld [vmem:[%s962_s19 + $0x200] sm:$0xff]  ;;  %v267_v0 = vld [vmem:[%s962_s19 + $0x210] sm:$0xff] }
  0x69   : > { %371 = vmatprep.subr.mxu0 %v306_v20  ;;  %442 = vmatprep.subr.mxu1 %v308_v21  ;;  %v200_v63 = vld [vmem:[#allocation2 + $0x8] sm:$0xff]  ;;  %v199_v1 = vld [vmem:[#allocation2] sm:$0xff] }
  0x6a   : > { %372 = vmatpush2.msra.mxu0 %v305_v22  ;;  %443 = vmatpush2.msra.mxu1 %v307_v23 }
  0x6b   : > { %373 = vmatprep.subr.mxu0 %v302_v24  ;;  %444 = vmatprep.subr.mxu1 %v304_v25 }
  0x6c   : > { %374 = vmatpush2.msra.mxu0 %v301_v26  ;;  %445 = vmatpush2.msra.mxu1 %v303_v27 }
  0x6d   : > { %375 = vmatprep.subr.mxu0 %v298_v28  ;;  %446 = vmatprep.subr.mxu1 %v300_v29 }
  0x6e   : > { %376 = vmatpush2.msra.mxu0 %v297_v30  ;;  %447 = vmatpush2.msra.mxu1 %v299_v31 }
  0x6f   : > { %377 = vmatprep.subr.mxu0 %v294_v32  ;;  %448 = vmatprep.subr.mxu1 %v296_v33 }
  0x70   : > { %378 = vmatpush2.msra.mxu0 %v293_v34  ;;  %449 = vmatpush2.msra.mxu1 %v295_v35 }
  0x71   : > { %379 = vmatprep.subr.mxu0 %v290_v36  ;;  %450 = vmatprep.subr.mxu1 %v292_v37 }
  0x72   : > { %380 = vmatpush2.msra.mxu0 %v289_v38  ;;  %451 = vmatpush2.msra.mxu1 %v291_v39 }
  0x73   : > { %381 = vmatprep.subr.mxu0 %v286_v40  ;;  %452 = vmatprep.subr.mxu1 %v288_v41 }
  0x74   : > { %382 = vmatpush2.msra.mxu0 %v285_v42  ;;  %453 = vmatpush2.msra.mxu1 %v287_v43 }
  0x75   : > { %383 = vmatprep.subr.mxu0 %v282_v44  ;;  %454 = vmatprep.subr.mxu1 %v284_v45 }
  0x76   : > { %384 = vmatpush2.msra.mxu0 %v281_v46  ;;  %455 = vmatpush2.msra.mxu1 %v283_v47 }
  0x77   : > { %385 = vmatprep.subr.mxu0 %v278_v48  ;;  %456 = vmatprep.subr.mxu1 %v280_v49 }
  0x78   : > { %386 = vmatpush2.msra.mxu0 %v277_v50  ;;  %457 = vmatpush2.msra.mxu1 %v279_v51 }
  0x79   : > { %387 = vmatprep.subr.mxu0 %v274_v52  ;;  %458 = vmatprep.subr.mxu1 %v276_v53 }
  0x7a   : > { %388 = vmatpush2.msra.mxu0 %v273_v54  ;;  %459 = vmatpush2.msra.mxu1 %v275_v55 }
  0x7b   : > { %389 = vmatprep.subr.mxu0 %v270_v56  ;;  %460 = vmatprep.subr.mxu1 %v272_v57 }
  0x7c   : > { %390 = vmatpush2.msra.mxu0 %v269_v58  ;;  %461 = vmatpush2.msra.mxu1 %v271_v59 }
  0x7d   : > { %391 = vmatprep.subr.mxu0 %v266_v60  ;;  %462 = vmatprep.subr.mxu1 %v268_v61 }
  0x7e   : > { %392 = vmatpush2.msra.mxu0 %v265_v62  ;;  %393 = vmatprep.mubr.f32.mxu0 %v200_v63 }
  0x7f   : > { %463 = vmatpush2.msra.mxu1 %v267_v0  ;;  %464 = vmatprep.mubr.f32.mxu1 %v200_v63 }
  0x80   : > { %394 = vmatmul.mubr.f32.vlgmr.msra.gmra.mxu0 %v199_v1  ;;  %465 = vmatmul.mubr.f32.vlgmr.msra.gmra.mxu1 %v199_v1 }
 0x140   : > { %v395_v2 = vpop.f32.mrf.mxu0  ;;  %v466_v3 = vpop.f32.mrf.mxu1 }
 0x141   : > { %471 = vst [vmem:[%s196_s20] sm:$0xff] %v395_v2  ;;  %473 = vst [vmem:[%s196_s20 + $0x10] sm:$0xff] %v466_v3 }
 0x142   : > { %v397_v4 = vpop.f32.mrf.mxu0  ;;  %v468_v5 = vpop.f32.mrf.mxu1 }
 0x143   : > { %472 = vst [vmem:[%s196_s20 + $0x8] sm:$0xff] %v397_v4  ;;  %474 = vst [vmem:[%s196_s20 + $0x18] sm:$0xff] %v468_v5 }
 0x144   : > { %749 = shalt.err (!%p746_p9)
}
 0x145   : > { %s750_s5 = scalar_lea.hbm %s1103_s30, 512  ;;  %s754_s29 = scalar_lea.hbm %s1151_s2, 1024 }
 0x146   : > { %p751_p0 = scmp.ne.s32.totalorder %s1103_s30, %s750_s5  ;;  %p755_p10 = scmp.lt.s32.totalorder %s1103_s30, %s1151_s2 }
 0x147   : > { %p756_p11 = scmp.lt.s32.totalorder %s754_s29, %s750_s5 }
 0x148   : > { %p752_p2 = pnand %p751_p0, %p1163_p13 }
 0x149   : > { %p757_p4 = por %p756_p11, %p755_p10 }
 0x14a   : > { %p753_p6 = pneg %p752_p2 }
 0x14c   : > { %p758_p3 = pnand %p757_p4, %p753_p6 }
 0x14e   : > { %761 = shalt.err (!%p758_p3)
}
 0x14f   : > { %612 = dma.vmem_to_hbm [thread:$0]  (%p1163_p13), %s1098_s23, 512, %s1103_s30, %s476_s25  }
 0x150 PF: > { %s504_s19 = sand.u32 1, %s800_s9   ;;  %p1164_p5 = scmp.ne.s32.totalorder %s1158_s22, 0 }
 0x151   : > { %p1165_p1 = scmp.ge.s32.totalorder %s820_s14, 2  ;;  %s505_s18 = scalar_lea.sflag [#allocation4], %s504_s19 }
 0x153   : > { %p623_p12 = pnand %p1165_p1, %p1164_p5 }
 0x155   : > { %p624_p7 = pneg %p623_p12 }
 0x157   : > { %795 = dma.done.wait (%p624_p7), %s505_s18, 512  }
 0x158   : > { %797 = vsyncadd (%p624_p7), %s505_s18, 4294966784  ;;  %s19_s14 = sadd.s32 1, %s820_s14   ;;  %s1166_s9 = smov %s804_s10 }
 0x159   : > { %p16_p8 = scmp.ge.s32.totalorder %s19_s14, 4   ;;  %s1167_s10 = smov %s808_s11 }
 0x15a   : > { %s1168_s11 = smov %s945_s27  ;;  %s1169_s12 = smov %s816_s13 }
 0x15b   : > { %s1170_s13 = smov %s1172_s28  ;;  %18 = sbr.rel (!%p16_p8) target bundleno = 7 (0x7), region = 79 }
 0x160   :  { %510 = vsyncpa [#allocation3], 1 }
 0x161   :  { %512 = vsyncpa [#allocation3 + $0x1], 1 }
 0x162   :  { %513 = vsyncpa [#allocation6], 1 }
 0x163   :  { %515 = vsyncpa [#allocation6 + $0x1], 1 }
 0x164   :  { %516 = vsyncpa [#allocation4], 1 }
 0x165   :  { %518 = vsyncpa [#allocation4 + $0x1], 1 }

</bundles_post_ra>
